<compile_context>
chip_gen: v5e
topology: v5e:2x2
jax: 0.10.0
libtpu: 0.0.40
codegen_flags: <defaults>
</compile_context>

<pallas_src>
import functools

import jax
import jax.numpy as jnp
from jax.experimental import pallas as pl
from jax.experimental.pallas import tpu as pltpu


def _mlp_kernel(x_ref, w1_ref, b1_ref, w2_ref, b2_ref, o_ref):
    # hidden = relu(x @ W1 + b1): MXU matmul with f32 accumulation,
    # bias add + ReLU on the VPU in f32.
    h = jnp.dot(x_ref[...], w1_ref[...], preferred_element_type=jnp.float32)
    h = jnp.maximum(h + b1_ref[...], 0.0)            # b1 is (1, hidden) -> broadcast
    # out = hidden @ W2 + b2: intentional f32 -> matmul-dtype cast for the MXU,
    # f32 accumulation, bias add in f32, store in o_ref's (bf16/f32) dtype.
    out = jnp.dot(h.astype(w2_ref.dtype), w2_ref[...],
                  preferred_element_type=jnp.float32)
    o_ref[...] = (out + b2_ref[...]).astype(o_ref.dtype)


def _round_up(x, m):
    return ((x + m - 1) // m) * m


@functools.partial(jax.jit, static_argnames=("block_batch", "matmul_dtype"))
def net_forward(x, w1, b1, w2, b2, *, block_batch=512, matmul_dtype=jnp.bfloat16):
    """Forward pass of Net.

    Args:
      x:  [batch, cols]             float32
      w1: [cols, size_hidden]       float32   (transposed PyTorch hidden.weight)
      b1: [size_hidden]             float32
      w2: [size_hidden, n_output]   float32   (transposed PyTorch predict.weight)
      b2: [n_output]                float32
      block_batch: max rows of x per grid step (512 is ~85% of HBM roofline;
        1024 is marginally better on v6e if VMEM allows, keep <=512 on v7x).
      matmul_dtype: dtype of MXU operands and of the kernel's output store
        (bf16 by default; pass jnp.float32 for bit-tight results).
    Returns:
      [batch, n_output] float32
    """
    batch, cols = x.shape
    size_hidden = w1.shape[1]
    n_output = w2.shape[1]
    md = jnp.dtype(matmul_dtype)

    # Lane-dense padded feature dims (multiples of 128).
    cols_p = _round_up(cols, 128)
    hid_p = _round_up(size_hidden, 128)
    nout_p = _round_up(n_output, 128)

    # Balanced batch tiling: <8 rows of padding waste per tile, and >=2 grid
    # steps whenever batch > 8 so v7x's two TensorCores both get work.
    num_tiles = pl.cdiv(batch, block_batch)
    num_tiles = max(num_tiles, min(2, pl.cdiv(batch, 8)))
    tb = _round_up(pl.cdiv(batch, num_tiles), 8)
    batch_p = num_tiles * tb

    # Zero-pad directly in the matmul dtype (fused pad + cast; exact, see
    # header comment). Biases stay f32 for the f32 epilogue.
    xp = jnp.zeros((batch_p, cols_p), md).at[:batch, :cols].set(x.astype(md))
    w1p = jnp.zeros((cols_p, hid_p), md).at[:cols, :size_hidden].set(w1.astype(md))
    b1p = jnp.zeros((1, hid_p), jnp.float32).at[0, :size_hidden].set(b1)
    w2p = jnp.zeros((hid_p, nout_p), md).at[:size_hidden, :n_output].set(w2.astype(md))
    b2p = jnp.zeros((1, nout_p), jnp.float32).at[0, :n_output].set(b2)

    # VMEM budget: single-buffered resident weights/biases, double-buffered
    # activation/output tiles, plus the f32 hidden temporary.
    md_b = md.itemsize
    vmem_needed = (
        cols_p * hid_p * md_b            # W1 (Buffered(1))
        + hid_p * nout_p * md_b          # W2 (Buffered(1))
        + (hid_p + nout_p) * 4           # biases, f32 (Buffered(1))
        + 2 * tb * cols_p * md_b         # x tile, double-buffered
        + 2 * tb * nout_p * md_b         # out tile, double-buffered
        + tb * hid_p * 4                 # f32 hidden temporary
    )
    vmem_limit = min(max(int(vmem_needed * 1.5) + (2 << 20), 32 << 20), 56 << 20)

    grid = (num_tiles,)
    resident = pl.Buffered(1)            # constant index map -> 1 buffer is enough

    out_p = pl.pallas_call(
        _mlp_kernel,
        out_shape=jax.ShapeDtypeStruct((batch_p, nout_p), md),
        grid_spec=pltpu.PrefetchScalarGridSpec(
            num_scalar_prefetch=0,
            grid=grid,
            in_specs=[
                # Activation tile: marches down the batch, double-buffered.
                pl.BlockSpec((tb, cols_p), lambda i: (i, 0)),
                # Weights / biases: constant index map -> resident in VMEM
                # across all grid steps, single-buffered.
                pl.BlockSpec((cols_p, hid_p), lambda i: (0, 0), pipeline_mode=resident),
                pl.BlockSpec((1, hid_p), lambda i: (0, 0), pipeline_mode=resident),
                pl.BlockSpec((hid_p, nout_p), lambda i: (0, 0), pipeline_mode=resident),
                pl.BlockSpec((1, nout_p), lambda i: (0, 0), pipeline_mode=resident),
            ],
            out_specs=pl.BlockSpec((tb, nout_p), lambda i: (i, 0)),
        ),
        compiler_params=pltpu.CompilerParams(
            # Batch steps are independent -> shard across TensorCores on v7x.
            dimension_semantics=("parallel",),
            vmem_limit_bytes=vmem_limit,
        ),
    )(xp, w1p, b1p, w2p, b2p)

    # TODO(synk): if resident W1/W2 ever outgrow the VMEM budget (~56 MiB here,
    # i.e. ~half the v6e threshold on v7x's 64 MiB VMEM), add a K grid axis
    # ("arbitrary", last) with an f32 VMEM accumulator + pl.when init/finalize
    # instead of weight residency. A lane-dense packed output slab (instead of
    # the padded nout_p=128 columns) is a further writeback win for tiny
    # n_output but is skipped here for simplicity.

    return out_p[:batch, :n_output].astype(jnp.float32)


def reference_forward(x, w1, b1, w2, b2):
    h = jnp.maximum(x @ w1 + b1, 0.0)
    return h @ w2 + b2


if __name__ == "__main__":
    # Small shapes consistent with the module's forward on 2-D input.
    batch, cols, size_hidden, n_output = 8, 16, 32, 4

    key = jax.random.PRNGKey(0)
    kx, kw1, kb1, kw2, kb2 = jax.random.split(key, 5)

    x = jax.random.normal(kx, (batch, cols), dtype=jnp.float32)
    # Deterministic synthetic parameters (mimic Linear init scale, fixed by seed).
    w1 = jax.random.normal(kw1, (cols, size_hidden), dtype=jnp.float32) * 0.1
    b1 = jax.random.normal(kb1, (size_hidden,), dtype=jnp.float32) * 0.1
    w2 = jax.random.normal(kw2, (size_hidden, n_output), dtype=jnp.float32) * 0.1
    b2 = jax.random.normal(kb2, (n_output,), dtype=jnp.float32) * 0.1

    ref = reference_forward(x, w1, b1, w2, b2)

    # 1) f32 matmul path: bit-tight correctness check of the kernel logic.
    out_f32 = jax.block_until_ready(
        net_forward(x, w1, b1, w2, b2, matmul_dtype=jnp.float32))
    assert out_f32.shape == (batch, n_output)
    assert jnp.allclose(out_f32, ref, atol=1e-5, rtol=1e-5)

    # 2) Default bf16 matmul + bf16 output-store path: looser tolerance.
    out = jax.block_until_ready(net_forward(x, w1, b1, w2, b2))
    assert out.shape == (batch, n_output)
    assert out.dtype == jnp.float32
    assert jnp.allclose(out, ref, atol=5e-2, rtol=5e-2)

    print("KERNEL_OK")
</pallas_src>

<mosaic_0001>
module attributes {stable_mosaic.version = 11 : i64} {
  func.func @_mlp_kernel(%arg0: i32, %arg1: memref<8x128xf32, #tpu.memory_space<vmem>>, %arg2: memref<128x128xf32, #tpu.memory_space<vmem>>, %arg3: memref<1x128xf32, #tpu.memory_space<vmem>>, %arg4: memref<128x128xf32, #tpu.memory_space<vmem>>, %arg5: memref<1x128xf32, #tpu.memory_space<vmem>>, %arg6: memref<8x128xf32, #tpu.memory_space<vmem>>) attributes {dimension_semantics = [#tpu.dimension_semantics<parallel>], iteration_bounds = array<i64: 1>, scalar_prefetch = 0 : i64, scratch_operands = 0 : i64, tpu.core_type = #tpu.core_type<tc>, window_params = [{transform_indices = @transform_0, window_bounds = array<i64: 8, 128>}, {pipeline_mode = #tpu.pipeline_mode<synchronous>, transform_indices = @transform_1, window_bounds = array<i64: 128, 128>}, {pipeline_mode = #tpu.pipeline_mode<synchronous>, transform_indices = @transform_2, window_bounds = array<i64: 1, 128>}, {pipeline_mode = #tpu.pipeline_mode<synchronous>, transform_indices = @transform_3, window_bounds = array<i64: 128, 128>}, {pipeline_mode = #tpu.pipeline_mode<synchronous>, transform_indices = @transform_4, window_bounds = array<i64: 1, 128>}, {transform_indices = @transform_5, window_bounds = array<i64: 8, 128>}]} {
    %c0 = arith.constant 0 : index
    %c0_0 = arith.constant 0 : index
    %0 = vector.load %arg1[%c0, %c0_0] : memref<8x128xf32, #tpu.memory_space<vmem>>, vector<8x128xf32>
    %c0_1 = arith.constant 0 : index
    %c0_2 = arith.constant 0 : index
    %1 = vector.load %arg2[%c0_1, %c0_2] : memref<128x128xf32, #tpu.memory_space<vmem>>, vector<128x128xf32>
    %cst = arith.constant dense<0.000000e+00> : vector<8x128xf32>
    %2 = tpu.matmul %0, %1, %cst {dimension_numbers = #tpu.dot_dimension_numbers<[1], [0], [0], [1], [0, 0, 1, 1], [], []>} : vector<8x128xf32>, vector<128x128xf32>, vector<8x128xf32> -> vector<8x128xf32>
    %c0_3 = arith.constant 0 : index
    %c0_4 = arith.constant 0 : index
    %3 = vector.load %arg3[%c0_3, %c0_4] : memref<1x128xf32, #tpu.memory_space<vmem>>, vector<1x128xf32>
    %4 = vector.broadcast %3 : vector<1x128xf32> to vector<8x128xf32>
    %5 = arith.addf %2, %4 : vector<8x128xf32>
    %cst_5 = arith.constant 0.000000e+00 : f32
    %6 = vector.broadcast %cst_5 : f32 to vector<8x128xf32>
    %7 = arith.maximumf %5, %6 : vector<8x128xf32>
    %c0_6 = arith.constant 0 : index
    %c0_7 = arith.constant 0 : index
    %8 = vector.load %arg4[%c0_6, %c0_7] : memref<128x128xf32, #tpu.memory_space<vmem>>, vector<128x128xf32>
    %cst_8 = arith.constant dense<0.000000e+00> : vector<8x128xf32>
    %9 = tpu.matmul %7, %8, %cst_8 {dimension_numbers = #tpu.dot_dimension_numbers<[1], [0], [0], [1], [0, 0, 1, 1], [], []>} : vector<8x128xf32>, vector<128x128xf32>, vector<8x128xf32> -> vector<8x128xf32>
    %c0_9 = arith.constant 0 : index
    %c0_10 = arith.constant 0 : index
    %10 = vector.load %arg5[%c0_9, %c0_10] : memref<1x128xf32, #tpu.memory_space<vmem>>, vector<1x128xf32>
    %11 = vector.broadcast %10 : vector<1x128xf32> to vector<8x128xf32>
    %12 = arith.addf %9, %11 : vector<8x128xf32>
    %c0_11 = arith.constant 0 : index
    %c0_12 = arith.constant 0 : index
    %13 = vector.load %arg6[%c0_11, %c0_12] : memref<8x128xf32, #tpu.memory_space<vmem>>, vector<8x128xf32>
    tpu.vector_store %arg6[%c0_11, %c0_12], %12 {strides = array<i32>} : memref<8x128xf32, #tpu.memory_space<vmem>>, vector<8x128xf32>,
    return
  }
  func.func @transform_0(%arg0: i32) -> (i32, i32) {
    %c0_i32 = arith.constant 0 : i32
    %c0_i32_0 = arith.constant 0 : i32
    return %arg0, %c0_i32 : i32, i32
  }
  func.func @transform_1(%arg0: i32) -> (i32, i32) {
    %c0_i32 = arith.constant 0 : i32
    %c0_i32_0 = arith.constant 0 : i32
    %c0_i32_1 = arith.constant 0 : i32
    return %c0_i32, %c0_i32_0 : i32, i32
  }
  func.func @transform_2(%arg0: i32) -> (i32, i32) {
    %c0_i32 = arith.constant 0 : i32
    %c0_i32_0 = arith.constant 0 : i32
    %c0_i32_1 = arith.constant 0 : i32
    return %c0_i32, %c0_i32_0 : i32, i32
  }
  func.func @transform_3(%arg0: i32) -> (i32, i32) {
    %c0_i32 = arith.constant 0 : i32
    %c0_i32_0 = arith.constant 0 : i32
    %c0_i32_1 = arith.constant 0 : i32
    return %c0_i32, %c0_i32_0 : i32, i32
  }
  func.func @transform_4(%arg0: i32) -> (i32, i32) {
    %c0_i32 = arith.constant 0 : i32
    %c0_i32_0 = arith.constant 0 : i32
    %c0_i32_1 = arith.constant 0 : i32
    return %c0_i32, %c0_i32_0 : i32, i32
  }
  func.func @transform_5(%arg0: i32) -> (i32, i32) {
    %c0_i32 = arith.constant 0 : i32
    %c0_i32_0 = arith.constant 0 : i32
    return %arg0, %c0_i32 : i32, i32
  }
}

</mosaic_0001>

<bundles_post_ra>
// kernel: net_forward.1
= control target key start
LH: loop header
LB: loop body
LE: loop exit
PB: predicated region body
PF: predicated region fallthrough
CT: control target
= control target key end

     0   :  { %s247_s1 = inlined_call_operand.vmem [shape: f32[128,128], index: 1, kind: input, shape index: {}]   ;;  %s248_s3 = inlined_call_operand.vmem [shape: f32[128,128], index: 3, kind: input, shape index: {}]   ;;  %s249_s2 = inlined_call_operand.vmem [shape: f32[1,128], index: 2, kind: input, shape index: {}]   ;;  %s250_s0 = inlined_call_operand.vmem [shape: f32[8,128], index: 0, kind: input, shape index: {}]   ;;  %s251_s4 = inlined_call_operand.vmem [shape: f32[1,128], index: 4, kind: input, shape index: {}]   ;;  %s252_s5 = inlined_call_operand.vmem [shape: f32[8,128], index: 5, kind: output, shape index: {}]  }
   0x1   :  { %v36_v0 = vld [vmem:[%s247_s1 + $0x78] sm:$0xff]  ;;  %v35_v1 = vld [vmem:[%s247_s1 + $0x70] sm:$0xff]  ;;  %v34_v2 = vld [vmem:[%s247_s1 + $0x68] sm:$0xff] }
   0x2   :  { %41 = vmatpush.msra.mxu0 %v36_v0  ;;  %v33_v3 = vld [vmem:[%s247_s1 + $0x60] sm:$0xff]  ;;  %v77_v4 = vld [vmem:[%s248_s3 + $0x78] sm:$0xff]  ;;  %v76_v6 = vld [vmem:[%s248_s3 + $0x70] sm:$0xff] }
   0x3   :  { %v32_v5 = vld [vmem:[%s247_s1 + $0x58] sm:$0xff]  ;;  %82 = vmatpush.msra.mxu1 %v77_v4  ;;  %v75_v7 = vld [vmem:[%s248_s3 + $0x68] sm:$0xff]  ;;  %v31_v8 = vld [vmem:[%s247_s1 + $0x50] sm:$0xff] }
   0x4   :  { %42 = vmatpush.msra.mxu0 %v35_v1  ;;  %v74_v9 = vld [vmem:[%s248_s3 + $0x60] sm:$0xff]  ;;  %v30_v10 = vld [vmem:[%s247_s1 + $0x48] sm:$0xff]  ;;  %v73_v11 = vld [vmem:[%s248_s3 + $0x58] sm:$0xff] }
   0x5   :  { %83 = vmatpush.msra.mxu1 %v76_v6  ;;  %v29_v12 = vld [vmem:[%s247_s1 + $0x40] sm:$0xff]  ;;  %v72_v13 = vld [vmem:[%s248_s3 + $0x50] sm:$0xff]  ;;  %v28_v14 = vld [vmem:[%s247_s1 + $0x38] sm:$0xff] }
   0x6   :  { %43 = vmatpush.msra.mxu0 %v34_v2  ;;  %v71_v15 = vld [vmem:[%s248_s3 + $0x48] sm:$0xff]  ;;  %v27_v16 = vld [vmem:[%s247_s1 + $0x30] sm:$0xff]  ;;  %v70_v17 = vld [vmem:[%s248_s3 + $0x40] sm:$0xff] }
   0x7   :  { %84 = vmatpush.msra.mxu1 %v75_v7  ;;  %v26_v18 = vld [vmem:[%s247_s1 + $0x28] sm:$0xff]  ;;  %v69_v19 = vld [vmem:[%s248_s3 + $0x38] sm:$0xff]  ;;  %v25_v20 = vld [vmem:[%s247_s1 + $0x20] sm:$0xff] }
   0x8   :  { %44 = vmatpush.msra.mxu0 %v33_v3  ;;  %v68_v21 = vld [vmem:[%s248_s3 + $0x30] sm:$0xff]  ;;  %v24_v22 = vld [vmem:[%s247_s1 + $0x18] sm:$0xff]  ;;  %v67_v23 = vld [vmem:[%s248_s3 + $0x28] sm:$0xff] }
   0x9   :  { %85 = vmatpush.msra.mxu1 %v74_v9  ;;  %v23_v24 = vld [vmem:[%s247_s1 + $0x10] sm:$0xff]  ;;  %v66_v25 = vld [vmem:[%s248_s3 + $0x20] sm:$0xff]  ;;  %v22_v26 = vld [vmem:[%s247_s1 + $0x8] sm:$0xff] }
   0xa   :  { %45 = vmatpush.msra.mxu0 %v32_v5  ;;  %v65_v27 = vld [vmem:[%s248_s3 + $0x18] sm:$0xff]  ;;  %v21_v28 = vld [vmem:[%s247_s1] sm:$0xff]  ;;  %v64_v30 = vld [vmem:[%s248_s3 + $0x10] sm:$0xff] }
   0xb   :  { %86 = vmatpush.msra.mxu1 %v73_v11  ;;  %v20_v29 = vld [vmem:[%s250_s0] sm:$0xff]  ;;  %v63_v31 = vld [vmem:[%s248_s3 + $0x8] sm:$0xff] }
   0xc   :  { %46 = vmatpush.msra.mxu0 %v31_v8  ;;  %v62_v32 = vld [vmem:[%s248_s3] sm:$0xff] }
   0xd   :  { %87 = vmatpush.msra.mxu1 %v72_v13  ;;  %v107_v33 = vld [vmem:[%s249_s2] ss:$0 sm:$0xff] }
   0xe   :  { %47 = vmatpush.msra.mxu0 %v30_v10  ;;  %v108_v37 = vld [vmem:[%s251_s4] ss:$0 sm:$0xff] }
   0xf   :  { %88 = vmatpush.msra.mxu1 %v71_v15 }
  0x10   :  { %48 = vmatpush.msra.mxu0 %v29_v12 }
  0x11   :  { %89 = vmatpush.msra.mxu1 %v70_v17 }
  0x12   :  { %49 = vmatpush.msra.mxu0 %v28_v14 }
  0x13   :  { %90 = vmatpush.msra.mxu1 %v69_v19 }
  0x14   :  { %50 = vmatpush.msra.mxu0 %v27_v16 }
  0x15   :  { %91 = vmatpush.msra.mxu1 %v68_v21 }
  0x16   :  { %51 = vmatpush.msra.mxu0 %v26_v18 }
  0x17   :  { %92 = vmatpush.msra.mxu1 %v67_v23 }
  0x18   :  { %52 = vmatpush.msra.mxu0 %v25_v20 }
  0x19   :  { %93 = vmatpush.msra.mxu1 %v66_v25 }
  0x1a   :  { %53 = vmatpush.msra.mxu0 %v24_v22 }
  0x1b   :  { %94 = vmatpush.msra.mxu1 %v65_v27 }
  0x1c   :  { %54 = vmatpush.msra.mxu0 %v23_v24 }
  0x1d   :  { %95 = vmatpush.msra.mxu1 %v64_v30 }
  0x1e   :  { %55 = vmatpush.msra.mxu0 %v22_v26 }
  0x1f   :  { %96 = vmatpush.msra.mxu1 %v63_v31 }
  0x20   :  { %56 = vmatpush.msra.mxu0 %v21_v28 }
  0x21   :  { %57 = vmatmul.f32.vlgmr.msra.gmra.mxu0 %v20_v29  ;;  %97 = vmatpush.msra.mxu1 %v62_v32 }
  0x9e   :  { %v58_v34 = vpop.f32.mrf.mxu0 }
  0x9f   :  { %v59_v35 = vadd.f32 %v107_v33, %v58_v34 }
  0xa1   :  { %v61_v36 = vmax.f32 %v59_v35, 0.0 }
  0xa3   :  { %98 = vmatmul.f32.vlgmr.msra.gmra.mxu1 %v61_v36 }
 0x120   :  { %v99_v38 = vpop.f32.mrf.mxu1 }
 0x121   :  { %v100_v39 = vadd.f32 %v108_v37, %v99_v38 }
 0x123   :  { %102 = vst [vmem:[%s252_s5] sm:$0xff] %v100_v39 }

</bundles_post_ra>
